<compile_context>
chip_gen: v5e
topology: v5e:2x2
jax: 0.10.0
libtpu: 0.0.40
codegen_flags: <defaults>
</compile_context>

<pallas_src>
import inspect
from functools import partial
from typing import Any, Callable, Dict, Optional, Tuple, Union

import jax
import jax.numpy as jnp
from jax import lax
from jax.experimental import pallas as pl
from jax.experimental.pallas import tpu as pltpu


# ----------------------------------------------------------------------------
# Pallas kernel: CUBA-LIF integration over a block of TT timesteps.
#   current[t] = x[t] @ W                       (single MXU matmul per block)
#   v[t]       = alpha * v[t-1] + current[t]    (VPU recurrence)
#   z[t]       = v[t] > threshold
#   v carry    = v_reset where spiked else v[t]
# Membrane state carries across the sequential time grid axis in VMEM scratch;
# per-timestep outputs are streamed back to HBM by BlockSpec.
# ----------------------------------------------------------------------------
ALPHA = 0.95
THRESHOLD = 1.0
V_RESET = 0.0

TN = 128            # output-feature tile (lane-dense)
SUBLANE = 8         # f32 sublane multiple
TARGET_M = 256      # MXU LHS rows target (good for v6e/v7x, fine on v5e)


def _lif_kernel(x_ref, w_ref, spikes_ref, membrane_ref, v_scratch, cur_scratch):
    # grid = (n_out_tiles [parallel], time_blocks [arbitrary/sequential])
    t = pl.program_id(1)

    @pl.when(t == 0)
    def _():
        v_scratch[...] = jnp.zeros_like(v_scratch)

    b_pad = v_scratch.shape[0]          # padded batch (multiple of 8)
    tt = x_ref.shape[0] // b_pad        # timesteps per block (static)

    # One MXU matmul for all TT timesteps of this block:
    #   (TT*B_pad, N_IN_pad) @ (N_IN_pad, TN) -> (TT*B_pad, TN), f32 accumulate.
    cur_scratch[...] = jnp.dot(
        x_ref[...], w_ref[...], preferred_element_type=jnp.float32
    )

    # Serial membrane recurrence over the TT timesteps (pure VPU work),
    # unrolled for LLO scheduling visibility. f32 throughout (v5e VPU has no
    # bf16 elementwise support).
    def body(i, v):
        row = pl.multiple_of(i * b_pad, SUBLANE)
        v = ALPHA * v + cur_scratch[pl.ds(row, b_pad), :]
        mask = v > THRESHOLD                      # compare once, reuse
        spikes_ref[pl.ds(row, b_pad), :] = mask.astype(spikes_ref.dtype)
        membrane_ref[pl.ds(row, b_pad), :] = v
        return jnp.where(mask, jnp.float32(V_RESET), v)

    v_scratch[...] = lax.fori_loop(0, tt, body, v_scratch[...], unroll=True)


def _round_up(x: int, m: int) -> int:
    return (x + m - 1) // m * m


def _pick_time_block(t_steps: int, b_pad: int) -> int:
    """Timesteps per grid step: aim for ~TARGET_M MXU rows without padding T."""
    tt = max(1, min(TARGET_M // b_pad, 64, t_steps))
    # Prefer an evenly dividing block size (within 2x of the target) to avoid
    # paying matmul/VPU work on padded timesteps.
    for cand in range(tt, max(1, tt // 2) - 1, -1):
        if t_steps % cand == 0:
            return cand
    return tt


def cuba_lif_integration(x: jax.Array, weight: jax.Array,
                         hw_data: Optional[Any] = None
                         ) -> Tuple[jax.Array, jax.Array]:
    """Pallas-backed forward func passed to HXModule (mock mode).

    :param x: synaptic input spikes/currents, shape (T, B, N_IN), float32.
    :param weight: synapse weight, shape (N_IN, N_OUT), float32.
    :returns: (spikes, membrane) each of shape (T, B, N_OUT), float32.
    """
    # TODO(synk): hw_data injection path (non-mock hardware observables) has
    # no Pallas equivalent; mock-mode compute only.
    T, B, N_IN = x.shape
    N_OUT = weight.shape[1]

    # --- pad to TPU-friendly shapes (lane=128, sublane=8) --------------------
    b_pad = _round_up(max(B, 1), SUBLANE)
    n_in_pad = _round_up(N_IN, 128)
    n_out_pad = _round_up(N_OUT, TN)
    tt = _pick_time_block(T, b_pad)
    t_pad = _round_up(T, tt)

    x_p = jnp.zeros((t_pad, b_pad, n_in_pad), jnp.float32)
    x_p = x_p.at[:T, :B, :N_IN].set(x.astype(jnp.float32))
    w_p = jnp.zeros((n_in_pad, n_out_pad), jnp.float32)
    w_p = w_p.at[:N_IN, :N_OUT].set(weight.astype(jnp.float32))

    # Present a lane/sublane-dense 2-D slab (time-major rows) to the kernel.
    x_2d = x_p.reshape(t_pad * b_pad, n_in_pad)

    grid = (n_out_pad // TN, t_pad // tt)

    spikes2d, membrane2d = pl.pallas_call(
        _lif_kernel,
        out_shape=(
            jax.ShapeDtypeStruct((t_pad * b_pad, n_out_pad), jnp.float32),
            jax.ShapeDtypeStruct((t_pad * b_pad, n_out_pad), jnp.float32),
        ),
        grid_spec=pltpu.PrefetchScalarGridSpec(
            num_scalar_prefetch=0,
            grid=grid,
            in_specs=[
                # x block: TT timesteps * padded batch rows, full N_IN_pad.
                pl.BlockSpec((tt * b_pad, n_in_pad), lambda n, t: (t, 0)),
                # weight tile: block index constant along the inner time axis
                # -> fetched once per output tile; small, so the default
                # double-buffering VMEM cost is negligible.
                pl.BlockSpec((n_in_pad, TN), lambda n, t: (0, n)),
            ],
            out_specs=[
                pl.BlockSpec((tt * b_pad, TN), lambda n, t: (t, n)),
                pl.BlockSpec((tt * b_pad, TN), lambda n, t: (t, n)),
            ],
            scratch_shapes=[
                pltpu.VMEM((b_pad, TN), jnp.float32),        # membrane carry
                pltpu.VMEM((tt * b_pad, TN), jnp.float32),   # block currents
            ],
        ),
        compiler_params=pltpu.CompilerParams(
            # N_OUT tiles are independent -> parallel (uses 2nd TC on v7x);
            # membrane state carries across time -> time axis is sequential.
            dimension_semantics=("parallel", "arbitrary"),
            vmem_limit_bytes=64 * 1024 * 1024,
        ),
    )(x_2d, w_p)

    spikes = spikes2d.reshape(t_pad, b_pad, n_out_pad)[:T, :B, :N_OUT]
    membrane = membrane2d.reshape(t_pad, b_pad, n_out_pad)[:T, :B, :N_OUT]
    return spikes, membrane


# ----------------------------------------------------------------------------
# HXModule framework glue (JAX-side mirror of the PyTorch module semantics).
# ----------------------------------------------------------------------------
class TensorHandle:
    """Holds (possibly multiple) data tensors produced by a layer."""

    def __init__(self, *data: Any) -> None:
        self._data: Tuple[Any, ...] = tuple(data)

    def put(self, *data: Any) -> None:
        self._data = tuple(data)

    @property
    def observable_state(self) -> Any:
        # first tensor of the handle is the observable state fed downstream
        return self._data[0] if self._data else None

    @property
    def data(self) -> Tuple[Any, ...]:
        return self._data


class Experiment:
    """Minimal mock Experiment: records (module, inputs, output) connections."""

    def __init__(self, mock: bool = True) -> None:
        self.mock = mock
        self._connections = []

    def connect(self, module: "HXModule",
                inputs: Union[Tuple[TensorHandle, ...], TensorHandle],
                output: TensorHandle) -> None:
        self._connections.append((module, inputs, output))

    def run(self) -> None:
        """Mock 'hxtorch.run': execute each registered module's forward."""
        hw_map: Dict[Any, Any] = {}
        for module, inputs, output in self._connections:
            module.exec_forward(inputs, output, hw_map)


class HXModule:
    """JAX mirror of hxtorch.spiking.modules.HXModule (mock mode)."""

    output_type = TensorHandle

    def __init__(self, experiment: Experiment, func: Callable) -> None:
        self._func_is_wrapped = False
        self._func_name = None
        self._changed_since_last_run = True
        self.experiment = experiment
        self.func = func
        self.extra_args: Tuple[Any, ...] = tuple()
        self.extra_kwargs: Dict[str, Any] = {}
        self.size: Optional[int] = None
        self._output_handle = self.output_type()
        self.descriptor = None

    def extra_repr(self) -> str:
        return f"function={self._func_name}, experiment={self.experiment}"

    # ---- func property / wrapping ------------------------------------------
    @property
    def func(self) -> Callable:
        if not self._func_is_wrapped:
            self._func = self._prepare_func(self._func)
            self._func_is_wrapped = True
        return self._func

    @func.setter
    def func(self, function: Optional[Callable]) -> None:
        self._func = function
        try:
            self._func_name = function.__name__ if function is not None else None
        except AttributeError:
            self._func_name = "unknown"
        self._func_is_wrapped = False

    @property
    def changed_since_last_run(self) -> bool:
        return self._changed_since_last_run

    def reset_changed_since_last_run(self) -> None:
        self._changed_since_last_run = False

    def _wrap_func(self, function: Callable) -> Tuple[Callable, Any]:
        signature = inspect.signature(function)
        for key, value in self.extra_kwargs.items():
            if key in signature.parameters and key != "hw_data":
                function = partial(function, **{key: value})
        return function, signature

    def _prepare_func(self, function: Callable) -> Callable:
        """Unify signature to func(inputs, hw_data=...)."""
        # TODO(synk): torch.autograd.Function branch of _prepare_func has no
        # JAX equivalent here; plain-callable (mock) branch implemented.
        local_func, signature = self._wrap_func(function)
        if "hw_data" in signature.parameters:
            def func(inputs, hw_data=None):
                return local_func(*inputs, *self.extra_args, hw_data=hw_data)
        else:
            def func(inputs, hw_data=None):
                return local_func(*inputs, *self.extra_args)
        return func

    # ---- forward / exec_forward --------------------------------------------
    def forward(self, *inputs: Union[Tuple[TensorHandle, ...], TensorHandle]
                ) -> TensorHandle:
        self.experiment.connect(self, inputs, self._output_handle)
        return self._output_handle

    __call__ = forward

    def exec_forward(self,
                     inputs: Union[Tuple[TensorHandle, ...], TensorHandle],
                     output: TensorHandle,
                     hw_map: Dict[Any, Any]) -> None:
        hw_data = hw_map.get(self.descriptor)
        if not isinstance(inputs, tuple):
            inputs = (inputs,)
        inputs = tuple(handle.observable_state for handle in inputs)
        out = self.func(inputs, hw_data=hw_data)
        out = (out,) if not isinstance(out, tuple) else out
        output.put(*out)


# ----------------------------------------------------------------------------
# Demo
# ----------------------------------------------------------------------------
if __name__ == "__main__":
    T, B, N_IN, N_OUT = 8, 2, 16, 32

    key = jax.random.PRNGKey(0)
    kx, kw = jax.random.split(key)
    x = jax.random.uniform(kx, (T, B, N_IN), dtype=jnp.float32)   # (T, B, N_IN)
    weight = (jax.random.normal(kw, (N_IN, N_OUT), dtype=jnp.float32)
              * (1.0 / jnp.sqrt(N_IN)))

    experiment = Experiment(mock=True)
    module = HXModule(experiment, func=cuba_lif_integration)
    # bind the deterministic weight via the module's extra_args mechanism
    module.extra_args = (weight,)

    input_handle = TensorHandle(x)
    output_handle = module(input_handle)   # registers layer in the experiment
    experiment.run()                       # executes Pallas kernel (mock run)

    spikes, membrane = output_handle.data
    jax.block_until_ready(spikes)
    jax.block_until_ready(membrane)

    assert spikes.shape == (T, B, N_OUT) and membrane.shape == (T, B, N_OUT)

    # quick correctness check against a pure-JAX reference
    def ref(x, w):
        v = jnp.zeros((B, N_OUT), jnp.float32)
        ss, vs = [], []
        for t in range(T):
            v = ALPHA * v + jnp.dot(x[t], w, preferred_element_type=jnp.float32)
            z = (v > THRESHOLD).astype(jnp.float32)
            ss.append(z)
            vs.append(v)
            v = jnp.where(z > 0.0, V_RESET, v)
        return jnp.stack(ss), jnp.stack(vs)

    s_ref, v_ref = ref(x, weight)
    assert jnp.allclose(spikes, s_ref)
    assert jnp.allclose(membrane, v_ref, atol=1e-4, rtol=1e-4)

    print("KERNEL_OK")
</pallas_src>

<mosaic_0001>
module attributes {stable_mosaic.version = 11 : i64} {
  func.func @_lif_kernel(%arg0: i32, %arg1: i32, %arg2: memref<64x128xf32, #tpu.memory_space<vmem>>, %arg3: memref<128x128xf32, #tpu.memory_space<vmem>>, %arg4: memref<64x128xf32, #tpu.memory_space<vmem>>, %arg5: memref<64x128xf32, #tpu.memory_space<vmem>>, %arg6: memref<8x128xf32, #tpu.memory_space<vmem>>, %arg7: memref<64x128xf32, #tpu.memory_space<vmem>>) attributes {dimension_semantics = [#tpu.dimension_semantics<parallel>, #tpu.dimension_semantics<arbitrary>], iteration_bounds = array<i64: 1, 1>, scalar_prefetch = 0 : i64, scratch_operands = 2 : i64, tpu.core_type = #tpu.core_type<tc>, window_params = [{transform_indices = @transform_0, window_bounds = array<i64: 64, 128>}, {transform_indices = @transform_1, window_bounds = array<i64: 128, 128>}, {transform_indices = @transform_2, window_bounds = array<i64: 64, 128>}, {transform_indices = @transform_3, window_bounds = array<i64: 64, 128>}]} {
    %c0_i32 = arith.constant 0 : i32
    %0 = arith.cmpi eq, %arg1, %c0_i32 : i32
    %1 = arith.extui %0 : i1 to i32
    %c0_i32_0 = arith.constant 0 : i32
    %2 = arith.cmpi ne, %1, %c0_i32_0 : i32
    scf.if %2 {
      %cst_67 = arith.constant 0.000000e+00 : f32
      %145 = vector.broadcast %cst_67 : f32 to vector<8x128xf32>
      %c0_68 = arith.constant 0 : index
      %c0_69 = arith.constant 0 : index
      %146 = vector.load %arg6[%c0_68, %c0_69] : memref<8x128xf32, #tpu.memory_space<vmem>>, vector<8x128xf32>
      tpu.vector_store %arg6[%c0_68, %c0_69], %145 {strides = array<i32>} : memref<8x128xf32, #tpu.memory_space<vmem>>, vector<8x128xf32>,
    } else {
    }
    %c0 = arith.constant 0 : index
    %c0_1 = arith.constant 0 : index
    %3 = vector.load %arg2[%c0, %c0_1] : memref<64x128xf32, #tpu.memory_space<vmem>>, vector<64x128xf32>
    %c0_2 = arith.constant 0 : index
    %c0_3 = arith.constant 0 : index
    %4 = vector.load %arg3[%c0_2, %c0_3] : memref<128x128xf32, #tpu.memory_space<vmem>>, vector<128x128xf32>
    %cst = arith.constant dense<0.000000e+00> : vector<64x128xf32>
    %5 = tpu.matmul %3, %4, %cst {dimension_numbers = #tpu.dot_dimension_numbers<[1], [0], [0], [1], [0, 0, 1, 1], [], []>} : vector<64x128xf32>, vector<128x128xf32>, vector<64x128xf32> -> vector<64x128xf32>
    %c0_4 = arith.constant 0 : index
    %c0_5 = arith.constant 0 : index
    %6 = vector.load %arg7[%c0_4, %c0_5] : memref<64x128xf32, #tpu.memory_space<vmem>>, vector<64x128xf32>
    tpu.vector_store %arg7[%c0_4, %c0_5], %5 {strides = array<i32>} : memref<64x128xf32, #tpu.memory_space<vmem>>, vector<64x128xf32>,
    %c0_6 = arith.constant 0 : index
    %c0_7 = arith.constant 0 : index
    %7 = vector.load %arg6[%c0_6, %c0_7] : memref<8x128xf32, #tpu.memory_space<vmem>>, vector<8x128xf32>
    %c0_i32_8 = arith.constant 0 : i32
    %c8_i32 = arith.constant 8 : i32
    %8 = arith.muli %c0_i32_8, %c8_i32 : i32
    %9 = tpu.assume_multiple %8, 8 : i32
    %cst_9 = arith.constant 0.949999988 : f32
    %10 = vector.broadcast %cst_9 : f32 to vector<8x128xf32>
    %11 = arith.mulf %10, %7 : vector<8x128xf32>
    %12 = arith.index_cast %9 : i32 to index
    %c0_10 = arith.constant 0 : index
    %13 = vector.load %arg7[%12, %c0_10] : memref<64x128xf32, #tpu.memory_space<vmem>>, vector<8x128xf32>
    %14 = arith.addf %11, %13 : vector<8x128xf32>
    %cst_11 = arith.constant 1.000000e+00 : f32
    %15 = vector.broadcast %cst_11 : f32 to vector<8x128xf32>
    %16 = arith.cmpf ogt, %14, %15 : vector<8x128xf32>
    %17 = arith.extui %16 : vector<8x128xi1> to vector<8x128xi32>
    %18 = arith.sitofp %17 : vector<8x128xi32> to vector<8x128xf32>
    %19 = arith.index_cast %9 : i32 to index
    %c0_12 = arith.constant 0 : index
    %20 = vector.load %arg4[%19, %c0_12] : memref<64x128xf32, #tpu.memory_space<vmem>>, vector<8x128xf32>
    tpu.vector_store %arg4[%19, %c0_12], %18 {strides = array<i32>} : memref<64x128xf32, #tpu.memory_space<vmem>>, vector<8x128xf32>,
    %21 = arith.index_cast %9 : i32 to index
    %c0_13 = arith.constant 0 : index
    %22 = vector.load %arg5[%21, %c0_13] : memref<64x128xf32, #tpu.memory_space<vmem>>, vector<8x128xf32>
    tpu.vector_store %arg5[%21, %c0_13], %14 {strides = array<i32>} : memref<64x128xf32, #tpu.memory_space<vmem>>, vector<8x128xf32>,
    %cst_14 = arith.constant 0.000000e+00 : f32
    %23 = vector.broadcast %cst_14 : f32 to vector<8x128xf32>
    %24 = arith.select %16, %23, %14 : vector<8x128xi1>, vector<8x128xf32>
    %c1_i32 = arith.constant 1 : i32
    %c8_i32_15 = arith.constant 8 : i32
    %25 = arith.muli %c1_i32, %c8_i32_15 : i32
    %26 = tpu.assume_multiple %25, 8 : i32
    %cst_16 = arith.constant 0.949999988 : f32
    %27 = vector.broadcast %cst_16 : f32 to vector<8x128xf32>
    %28 = arith.mulf %27, %24 : vector<8x128xf32>
    %29 = arith.index_cast %26 : i32 to index
    %c0_17 = arith.constant 0 : index
    %30 = vector.load %arg7[%29, %c0_17] : memref<64x128xf32, #tpu.memory_space<vmem>>, vector<8x128xf32>
    %31 = arith.addf %28, %30 : vector<8x128xf32>
    %cst_18 = arith.constant 1.000000e+00 : f32
    %32 = vector.broadcast %cst_18 : f32 to vector<8x128xf32>
    %33 = arith.cmpf ogt, %31, %32 : vector<8x128xf32>
    %34 = arith.extui %33 : vector<8x128xi1> to vector<8x128xi32>
    %35 = arith.sitofp %34 : vector<8x128xi32> to vector<8x128xf32>
    %36 = arith.index_cast %26 : i32 to index
    %c0_19 = arith.constant 0 : index
    %37 = vector.load %arg4[%36, %c0_19] : memref<64x128xf32, #tpu.memory_space<vmem>>, vector<8x128xf32>
    tpu.vector_store %arg4[%36, %c0_19], %35 {strides = array<i32>} : memref<64x128xf32, #tpu.memory_space<vmem>>, vector<8x128xf32>,
    %38 = arith.index_cast %26 : i32 to index
    %c0_20 = arith.constant 0 : index
    %39 = vector.load %arg5[%38, %c0_20] : memref<64x128xf32, #tpu.memory_space<vmem>>, vector<8x128xf32>
    tpu.vector_store %arg5[%38, %c0_20], %31 {strides = array<i32>} : memref<64x128xf32, #tpu.memory_space<vmem>>, vector<8x128xf32>,
    %cst_21 = arith.constant 0.000000e+00 : f32
    %40 = vector.broadcast %cst_21 : f32 to vector<8x128xf32>
    %41 = arith.select %33, %40, %31 : vector<8x128xi1>, vector<8x128xf32>
    %c2_i32 = arith.constant 2 : i32
    %c8_i32_22 = arith.constant 8 : i32
    %42 = arith.muli %c2_i32, %c8_i32_22 : i32
    %43 = tpu.assume_multiple %42, 8 : i32
    %cst_23 = arith.constant 0.949999988 : f32
    %44 = vector.broadcast %cst_23 : f32 to vector<8x128xf32>
    %45 = arith.mulf %44, %41 : vector<8x128xf32>
    %46 = arith.index_cast %43 : i32 to index
    %c0_24 = arith.constant 0 : index
    %47 = vector.load %arg7[%46, %c0_24] : memref<64x128xf32, #tpu.memory_space<vmem>>, vector<8x128xf32>
    %48 = arith.addf %45, %47 : vector<8x128xf32>
    %cst_25 = arith.constant 1.000000e+00 : f32
    %49 = vector.broadcast %cst_25 : f32 to vector<8x128xf32>
    %50 = arith.cmpf ogt, %48, %49 : vector<8x128xf32>
    %51 = arith.extui %50 : vector<8x128xi1> to vector<8x128xi32>
    %52 = arith.sitofp %51 : vector<8x128xi32> to vector<8x128xf32>
    %53 = arith.index_cast %43 : i32 to index
    %c0_26 = arith.constant 0 : index
    %54 = vector.load %arg4[%53, %c0_26] : memref<64x128xf32, #tpu.memory_space<vmem>>, vector<8x128xf32>
    tpu.vector_store %arg4[%53, %c0_26], %52 {strides = array<i32>} : memref<64x128xf32, #tpu.memory_space<vmem>>, vector<8x128xf32>,
    %55 = arith.index_cast %43 : i32 to index
    %c0_27 = arith.constant 0 : index
    %56 = vector.load %arg5[%55, %c0_27] : memref<64x128xf32, #tpu.memory_space<vmem>>, vector<8x128xf32>
    tpu.vector_store %arg5[%55, %c0_27], %48 {strides = array<i32>} : memref<64x128xf32, #tpu.memory_space<vmem>>, vector<8x128xf32>,
    %cst_28 = arith.constant 0.000000e+00 : f32
    %57 = vector.broadcast %cst_28 : f32 to vector<8x128xf32>
    %58 = arith.select %50, %57, %48 : vector<8x128xi1>, vector<8x128xf32>
    %c3_i32 = arith.constant 3 : i32
    %c8_i32_29 = arith.constant 8 : i32
    %59 = arith.muli %c3_i32, %c8_i32_29 : i32
    %60 = tpu.assume_multiple %59, 8 : i32
    %cst_30 = arith.constant 0.949999988 : f32
    %61 = vector.broadcast %cst_30 : f32 to vector<8x128xf32>
    %62 = arith.mulf %61, %58 : vector<8x128xf32>
    %63 = arith.index_cast %60 : i32 to index
    %c0_31 = arith.constant 0 : index
    %64 = vector.load %arg7[%63, %c0_31] : memref<64x128xf32, #tpu.memory_space<vmem>>, vector<8x128xf32>
    %65 = arith.addf %62, %64 : vector<8x128xf32>
    %cst_32 = arith.constant 1.000000e+00 : f32
    %66 = vector.broadcast %cst_32 : f32 to vector<8x128xf32>
    %67 = arith.cmpf ogt, %65, %66 : vector<8x128xf32>
    %68 = arith.extui %67 : vector<8x128xi1> to vector<8x128xi32>
    %69 = arith.sitofp %68 : vector<8x128xi32> to vector<8x128xf32>
    %70 = arith.index_cast %60 : i32 to index
    %c0_33 = arith.constant 0 : index
    %71 = vector.load %arg4[%70, %c0_33] : memref<64x128xf32, #tpu.memory_space<vmem>>, vector<8x128xf32>
    tpu.vector_store %arg4[%70, %c0_33], %69 {strides = array<i32>} : memref<64x128xf32, #tpu.memory_space<vmem>>, vector<8x128xf32>,
    %72 = arith.index_cast %60 : i32 to index
    %c0_34 = arith.constant 0 : index
    %73 = vector.load %arg5[%72, %c0_34] : memref<64x128xf32, #tpu.memory_space<vmem>>, vector<8x128xf32>
    tpu.vector_store %arg5[%72, %c0_34], %65 {strides = array<i32>} : memref<64x128xf32, #tpu.memory_space<vmem>>, vector<8x128xf32>,
    %cst_35 = arith.constant 0.000000e+00 : f32
    %74 = vector.broadcast %cst_35 : f32 to vector<8x128xf32>
    %75 = arith.select %67, %74, %65 : vector<8x128xi1>, vector<8x128xf32>
    %c4_i32 = arith.constant 4 : i32
    %c8_i32_36 = arith.constant 8 : i32
    %76 = arith.muli %c4_i32, %c8_i32_36 : i32
    %77 = tpu.assume_multiple %76, 8 : i32
    %cst_37 = arith.constant 0.949999988 : f32
    %78 = vector.broadcast %cst_37 : f32 to vector<8x128xf32>
    %79 = arith.mulf %78, %75 : vector<8x128xf32>
    %80 = arith.index_cast %77 : i32 to index
    %c0_38 = arith.constant 0 : index
    %81 = vector.load %arg7[%80, %c0_38] : memref<64x128xf32, #tpu.memory_space<vmem>>, vector<8x128xf32>
    %82 = arith.addf %79, %81 : vector<8x128xf32>
    %cst_39 = arith.constant 1.000000e+00 : f32
    %83 = vector.broadcast %cst_39 : f32 to vector<8x128xf32>
    %84 = arith.cmpf ogt, %82, %83 : vector<8x128xf32>
    %85 = arith.extui %84 : vector<8x128xi1> to vector<8x128xi32>
    %86 = arith.sitofp %85 : vector<8x128xi32> to vector<8x128xf32>
    %87 = arith.index_cast %77 : i32 to index
    %c0_40 = arith.constant 0 : index
    %88 = vector.load %arg4[%87, %c0_40] : memref<64x128xf32, #tpu.memory_space<vmem>>, vector<8x128xf32>
    tpu.vector_store %arg4[%87, %c0_40], %86 {strides = array<i32>} : memref<64x128xf32, #tpu.memory_space<vmem>>, vector<8x128xf32>,
    %89 = arith.index_cast %77 : i32 to index
    %c0_41 = arith.constant 0 : index
    %90 = vector.load %arg5[%89, %c0_41] : memref<64x128xf32, #tpu.memory_space<vmem>>, vector<8x128xf32>
    tpu.vector_store %arg5[%89, %c0_41], %82 {strides = array<i32>} : memref<64x128xf32, #tpu.memory_space<vmem>>, vector<8x128xf32>,
    %cst_42 = arith.constant 0.000000e+00 : f32
    %91 = vector.broadcast %cst_42 : f32 to vector<8x128xf32>
    %92 = arith.select %84, %91, %82 : vector<8x128xi1>, vector<8x128xf32>
    %c5_i32 = arith.constant 5 : i32
    %c8_i32_43 = arith.constant 8 : i32
    %93 = arith.muli %c5_i32, %c8_i32_43 : i32
    %94 = tpu.assume_multiple %93, 8 : i32
    %cst_44 = arith.constant 0.949999988 : f32
    %95 = vector.broadcast %cst_44 : f32 to vector<8x128xf32>
    %96 = arith.mulf %95, %92 : vector<8x128xf32>
    %97 = arith.index_cast %94 : i32 to index
    %c0_45 = arith.constant 0 : index
    %98 = vector.load %arg7[%97, %c0_45] : memref<64x128xf32, #tpu.memory_space<vmem>>, vector<8x128xf32>
    %99 = arith.addf %96, %98 : vector<8x128xf32>
    %cst_46 = arith.constant 1.000000e+00 : f32
    %100 = vector.broadcast %cst_46 : f32 to vector<8x128xf32>
    %101 = arith.cmpf ogt, %99, %100 : vector<8x128xf32>
    %102 = arith.extui %101 : vector<8x128xi1> to vector<8x128xi32>
    %103 = arith.sitofp %102 : vector<8x128xi32> to vector<8x128xf32>
    %104 = arith.index_cast %94 : i32 to index
    %c0_47 = arith.constant 0 : index
    %105 = vector.load %arg4[%104, %c0_47] : memref<64x128xf32, #tpu.memory_space<vmem>>, vector<8x128xf32>
    tpu.vector_store %arg4[%104, %c0_47], %103 {strides = array<i32>} : memref<64x128xf32, #tpu.memory_space<vmem>>, vector<8x128xf32>,
    %106 = arith.index_cast %94 : i32 to index
    %c0_48 = arith.constant 0 : index
    %107 = vector.load %arg5[%106, %c0_48] : memref<64x128xf32, #tpu.memory_space<vmem>>, vector<8x128xf32>
    tpu.vector_store %arg5[%106, %c0_48], %99 {strides = array<i32>} : memref<64x128xf32, #tpu.memory_space<vmem>>, vector<8x128xf32>,
    %cst_49 = arith.constant 0.000000e+00 : f32
    %108 = vector.broadcast %cst_49 : f32 to vector<8x128xf32>
    %109 = arith.select %101, %108, %99 : vector<8x128xi1>, vector<8x128xf32>
    %c6_i32 = arith.constant 6 : i32
    %c8_i32_50 = arith.constant 8 : i32
    %110 = arith.muli %c6_i32, %c8_i32_50 : i32
    %111 = tpu.assume_multiple %110, 8 : i32
    %cst_51 = arith.constant 0.949999988 : f32
    %112 = vector.broadcast %cst_51 : f32 to vector<8x128xf32>
    %113 = arith.mulf %112, %109 : vector<8x128xf32>
    %114 = arith.index_cast %111 : i32 to index
    %c0_52 = arith.constant 0 : index
    %115 = vector.load %arg7[%114, %c0_52] : memref<64x128xf32, #tpu.memory_space<vmem>>, vector<8x128xf32>
    %116 = arith.addf %113, %115 : vector<8x128xf32>
    %cst_53 = arith.constant 1.000000e+00 : f32
    %117 = vector.broadcast %cst_53 : f32 to vector<8x128xf32>
    %118 = arith.cmpf ogt, %116, %117 : vector<8x128xf32>
    %119 = arith.extui %118 : vector<8x128xi1> to vector<8x128xi32>
    %120 = arith.sitofp %119 : vector<8x128xi32> to vector<8x128xf32>
    %121 = arith.index_cast %111 : i32 to index
    %c0_54 = arith.constant 0 : index
    %122 = vector.load %arg4[%121, %c0_54] : memref<64x128xf32, #tpu.memory_space<vmem>>, vector<8x128xf32>
    tpu.vector_store %arg4[%121, %c0_54], %120 {strides = array<i32>} : memref<64x128xf32, #tpu.memory_space<vmem>>, vector<8x128xf32>,
    %123 = arith.index_cast %111 : i32 to index
    %c0_55 = arith.constant 0 : index
    %124 = vector.load %arg5[%123, %c0_55] : memref<64x128xf32, #tpu.memory_space<vmem>>, vector<8x128xf32>
    tpu.vector_store %arg5[%123, %c0_55], %116 {strides = array<i32>} : memref<64x128xf32, #tpu.memory_space<vmem>>, vector<8x128xf32>,
    %cst_56 = arith.constant 0.000000e+00 : f32
    %125 = vector.broadcast %cst_56 : f32 to vector<8x128xf32>
    %126 = arith.select %118, %125, %116 : vector<8x128xi1>, vector<8x128xf32>
    %c7_i32 = arith.constant 7 : i32
    %c8_i32_57 = arith.constant 8 : i32
    %127 = arith.muli %c7_i32, %c8_i32_57 : i32
    %128 = tpu.assume_multiple %127, 8 : i32
    %cst_58 = arith.constant 0.949999988 : f32
    %129 = vector.broadcast %cst_58 : f32 to vector<8x128xf32>
    %130 = arith.mulf %129, %126 : vector<8x128xf32>
    %131 = arith.index_cast %128 : i32 to index
    %c0_59 = arith.constant 0 : index
    %132 = vector.load %arg7[%131, %c0_59] : memref<64x128xf32, #tpu.memory_space<vmem>>, vector<8x128xf32>
    %133 = arith.addf %130, %132 : vector<8x128xf32>
    %cst_60 = arith.constant 1.000000e+00 : f32
    %134 = vector.broadcast %cst_60 : f32 to vector<8x128xf32>
    %135 = arith.cmpf ogt, %133, %134 : vector<8x128xf32>
    %136 = arith.extui %135 : vector<8x128xi1> to vector<8x128xi32>
    %137 = arith.sitofp %136 : vector<8x128xi32> to vector<8x128xf32>
    %138 = arith.index_cast %128 : i32 to index
    %c0_61 = arith.constant 0 : index
    %139 = vector.load %arg4[%138, %c0_61] : memref<64x128xf32, #tpu.memory_space<vmem>>, vector<8x128xf32>
    tpu.vector_store %arg4[%138, %c0_61], %137 {strides = array<i32>} : memref<64x128xf32, #tpu.memory_space<vmem>>, vector<8x128xf32>,
    %140 = arith.index_cast %128 : i32 to index
    %c0_62 = arith.constant 0 : index
    %141 = vector.load %arg5[%140, %c0_62] : memref<64x128xf32, #tpu.memory_space<vmem>>, vector<8x128xf32>
    tpu.vector_store %arg5[%140, %c0_62], %133 {strides = array<i32>} : memref<64x128xf32, #tpu.memory_space<vmem>>, vector<8x128xf32>,
    %cst_63 = arith.constant 0.000000e+00 : f32
    %142 = vector.broadcast %cst_63 : f32 to vector<8x128xf32>
    %143 = arith.select %135, %142, %133 : vector<8x128xi1>, vector<8x128xf32>
    %c8_i32_64 = arith.constant 8 : i32
    %c0_65 = arith.constant 0 : index
    %c0_66 = arith.constant 0 : index
    %144 = vector.load %arg6[%c0_65, %c0_66] : memref<8x128xf32, #tpu.memory_space<vmem>>, vector<8x128xf32>
    tpu.vector_store %arg6[%c0_65, %c0_66], %143 {strides = array<i32>} : memref<8x128xf32, #tpu.memory_space<vmem>>, vector<8x128xf32>,
    return
  }
  func.func @transform_0(%arg0: i32, %arg1: i32) -> (i32, i32) {
    %c0_i32 = arith.constant 0 : i32
    %c0_i32_0 = arith.constant 0 : i32
    return %arg1, %c0_i32 : i32, i32
  }
  func.func @transform_1(%arg0: i32, %arg1: i32) -> (i32, i32) {
    %c0_i32 = arith.constant 0 : i32
    %c0_i32_0 = arith.constant 0 : i32
    return %c0_i32, %arg0 : i32, i32
  }
  func.func @transform_2(%arg0: i32, %arg1: i32) -> (i32, i32) {
    %c0_i32 = arith.constant 0 : i32
    return %arg1, %arg0 : i32, i32
  }
  func.func @transform_3(%arg0: i32, %arg1: i32) -> (i32, i32) {
    %c0_i32 = arith.constant 0 : i32
    return %arg1, %arg0 : i32, i32
  }
}

</mosaic_0001>

<bundles_post_ra>
// kernel: tpu_custom_call.1
= control target key start
LH: loop header
LB: loop body
LE: loop exit
PB: predicated region body
PF: predicated region fallthrough
CT: control target
= control target key end

     0   :  { %9 = vsyncpa [#allocation5], 0  ;;  %s484_s0 = inlined_call_operand.hbm [shape: f32[64,128], index: 0, kind: input, shape index: {}]   ;;  %s485_s1 = inlined_call_operand.hbm [shape: f32[128,128], index: 1, kind: input, shape index: {}]   ;;  %s486_s2 = inlined_call_operand.hbm [shape: f32[64,128], index: 2, kind: output, shape index: {0}]   ;;  %s487_s3 = inlined_call_operand.hbm [shape: f32[64,128], index: 3, kind: output, shape index: {1}]  }
   0x1   :  { %10 = vsyncpa [#allocation8], 0 }
   0x2   :  { %11 = vsyncpa [#allocation6], 0 }
   0x3   :  { %12 = vsyncpa [#allocation11], 0  ;;  %s17_s14 = sshll.u32 %s484_s0, 4  ;;  %s425_s15 = smov [#allocation4]   ;;  %s18_s14 = int_to_ptr.hbm [resolvable:$true] %s17_s14 }
   0x4   :  { %s19_s16 = sshll.u32 %s425_s15, 4  ;;  %s30_s19 = sshll.u32 %s485_s1, 4  ;;  %s20_s16 = int_to_ptr.vmem [resolvable:$true] %s19_s16  ;;  %s31_s19 = int_to_ptr.hbm [resolvable:$true] %s30_s19 }
   0x5   :  { %s426_s20 = smov 128   ;;  %s427_s21 = smov 8  }
   0x6   :  { %25 = dma.hbm_to_vmem [thread:$0]  %s18_s14, 1024, %s20_s16, [#allocation5], %s426_s20, %s426_s20, %s427_s21  }
   0x7   :  { %s428_s22 = smov [#allocation7]  }
   0x8   :  { %s32_s23 = sshll.u32 %s428_s22, 4  ;;  %s33_s23 = int_to_ptr.vmem [resolvable:$true] %s32_s23 }
   0x9   :  { %38 = dma.hbm_to_vmem [thread:$0]  %s31_s19, 2048, %s33_s23, [#allocation8], %s426_s20, %s426_s20, %s427_s21  }
   0xa   :  { %417 = dma.done.wait [#allocation5], 1024  }
   0xb   :  { %418 = vsyncadd [#allocation5], 4294966272 }
   0xc   :  { %419 = dma.done.wait [#allocation8], 2048  }
   0xd   :  { %420 = vsyncadd [#allocation8], 4294965248  ;;  %v75_v0 = vld [vmem:[#allocation7 + $0x78] sm:$0xff]  ;;  %v74_v1 = vld [vmem:[#allocation7 + $0x70] sm:$0xff]  ;;  %v429_v25 = vmov 0.0   ;;  %s430_s0 = smov [#allocation10]  }
   0xe   :  { %76 = vmatpush.msra.mxu0 %v75_v0  ;;  %266 = vmatpush.msra.mxu1 %v75_v0  ;;  %v73_v2 = vld [vmem:[#allocation7 + $0x68] sm:$0xff]  ;;  %v72_v3 = vld [vmem:[#allocation7 + $0x60] sm:$0xff]  ;;  %v71_v4 = vld [vmem:[#allocation7 + $0x58] sm:$0xff]  ;;  %s237_s1 = sshll.u32 %s430_s0, 4  ;;  %s239_s26 = sshll.u32 %s487_s3, 4  ;;  %s238_s1 = int_to_ptr.vmem [resolvable:$true] %s237_s1  ;;  %s240_s26 = int_to_ptr.hbm [resolvable:$true] %s239_s26 }
   0xf   :  { %267 = vmatpush.msra.mxu2 %v75_v0  ;;  %268 = vmatpush.msra.mxu3 %v75_v0  ;;  %v70_v5 = vld [vmem:[#allocation7 + $0x50] sm:$0xff]  ;;  %v69_v6 = vld [vmem:[#allocation7 + $0x48] sm:$0xff]  ;;  %v68_v7 = vld [vmem:[#allocation7 + $0x40] sm:$0xff]  ;;  %s431_s27 = smov [#allocation9]   ;;  %s226_s4 = sshll.u32 %s486_s2, 4  ;;  %s227_s4 = int_to_ptr.hbm [resolvable:$true] %s226_s4 }
  0x10   :  { %77 = vmatpush.msra.mxu0 %v74_v1  ;;  %269 = vmatpush.msra.mxu1 %v74_v1  ;;  %v67_v8 = vld [vmem:[#allocation7 + $0x38] sm:$0xff]  ;;  %v66_v9 = vld [vmem:[#allocation7 + $0x30] sm:$0xff]  ;;  %v65_v10 = vld [vmem:[#allocation7 + $0x28] sm:$0xff]  ;;  %s224_s28 = sshll.u32 %s431_s27, 4  ;;  %s225_s28 = int_to_ptr.vmem [resolvable:$true] %s224_s28 }
  0x11   :  { %270 = vmatpush.msra.mxu2 %v74_v1  ;;  %271 = vmatpush.msra.mxu3 %v74_v1  ;;  %v64_v11 = vld [vmem:[#allocation7 + $0x20] sm:$0xff]  ;;  %v63_v12 = vld [vmem:[#allocation7 + $0x18] sm:$0xff]  ;;  %v62_v13 = vld [vmem:[#allocation7 + $0x10] sm:$0xff] }
  0x12   :  { %78 = vmatpush.msra.mxu0 %v73_v2  ;;  %272 = vmatpush.msra.mxu1 %v73_v2  ;;  %v61_v14 = vld [vmem:[#allocation7 + $0x8] sm:$0xff]  ;;  %v60_v15 = vld [vmem:[#allocation7] sm:$0xff]  ;;  %v54_v17 = vld [vmem:[#allocation4 + $0x10] sm:$0xff] }
  0x13   :  { %273 = vmatpush.msra.mxu2 %v73_v2  ;;  %274 = vmatpush.msra.mxu3 %v73_v2  ;;  %v52_v16 = vld [vmem:[#allocation4] sm:$0xff]  ;;  %v58_v19 = vld [vmem:[#allocation4 + $0x30] sm:$0xff]  ;;  %v53_v20 = vld [vmem:[#allocation4 + $0x8] sm:$0xff] }
  0x14   :  { %79 = vmatpush.msra.mxu0 %v72_v3  ;;  %275 = vmatpush.msra.mxu1 %v72_v3  ;;  %v56_v18 = vld [vmem:[#allocation4 + $0x20] sm:$0xff]  ;;  %v55_v21 = vld [vmem:[#allocation4 + $0x18] sm:$0xff]  ;;  %v57_v22 = vld [vmem:[#allocation4 + $0x28] sm:$0xff] }
  0x15   :  { %276 = vmatpush.msra.mxu2 %v72_v3  ;;  %277 = vmatpush.msra.mxu3 %v72_v3  ;;  %v59_v23 = vld [vmem:[#allocation4 + $0x38] sm:$0xff] }
  0x16   :  { %80 = vmatpush.msra.mxu0 %v71_v4  ;;  %278 = vmatpush.msra.mxu1 %v71_v4 }
  0x17   :  { %279 = vmatpush.msra.mxu2 %v71_v4  ;;  %280 = vmatpush.msra.mxu3 %v71_v4 }
  0x18   :  { %81 = vmatpush.msra.mxu0 %v70_v5  ;;  %281 = vmatpush.msra.mxu1 %v70_v5 }
  0x19   :  { %282 = vmatpush.msra.mxu2 %v70_v5  ;;  %283 = vmatpush.msra.mxu3 %v70_v5 }
  0x1a   :  { %82 = vmatpush.msra.mxu0 %v69_v6  ;;  %284 = vmatpush.msra.mxu1 %v69_v6 }
  0x1b   :  { %285 = vmatpush.msra.mxu2 %v69_v6  ;;  %286 = vmatpush.msra.mxu3 %v69_v6 }
  0x1c   :  { %83 = vmatpush.msra.mxu0 %v68_v7  ;;  %287 = vmatpush.msra.mxu1 %v68_v7 }
  0x1d   :  { %288 = vmatpush.msra.mxu2 %v68_v7  ;;  %289 = vmatpush.msra.mxu3 %v68_v7 }
  0x1e   :  { %84 = vmatpush.msra.mxu0 %v67_v8  ;;  %290 = vmatpush.msra.mxu1 %v67_v8 }
  0x1f   :  { %291 = vmatpush.msra.mxu2 %v67_v8  ;;  %292 = vmatpush.msra.mxu3 %v67_v8 }
  0x20   :  { %85 = vmatpush.msra.mxu0 %v66_v9  ;;  %293 = vmatpush.msra.mxu1 %v66_v9 }
  0x21   :  { %294 = vmatpush.msra.mxu2 %v66_v9  ;;  %295 = vmatpush.msra.mxu3 %v66_v9 }
  0x22   :  { %86 = vmatpush.msra.mxu0 %v65_v10  ;;  %296 = vmatpush.msra.mxu1 %v65_v10 }
  0x23   :  { %297 = vmatpush.msra.mxu2 %v65_v10  ;;  %298 = vmatpush.msra.mxu3 %v65_v10 }
  0x24   :  { %87 = vmatpush.msra.mxu0 %v64_v11  ;;  %299 = vmatpush.msra.mxu1 %v64_v11 }
  0x25   :  { %300 = vmatpush.msra.mxu2 %v64_v11  ;;  %301 = vmatpush.msra.mxu3 %v64_v11 }
  0x26   :  { %88 = vmatpush.msra.mxu0 %v63_v12  ;;  %302 = vmatpush.msra.mxu1 %v63_v12 }
  0x27   :  { %303 = vmatpush.msra.mxu2 %v63_v12  ;;  %304 = vmatpush.msra.mxu3 %v63_v12 }
  0x28   :  { %89 = vmatpush.msra.mxu0 %v62_v13  ;;  %305 = vmatpush.msra.mxu1 %v62_v13 }
  0x29   :  { %306 = vmatpush.msra.mxu2 %v62_v13  ;;  %307 = vmatpush.msra.mxu3 %v62_v13 }
  0x2a   :  { %90 = vmatpush.msra.mxu0 %v61_v14  ;;  %308 = vmatpush.msra.mxu1 %v61_v14 }
  0x2b   :  { %309 = vmatpush.msra.mxu2 %v61_v14  ;;  %310 = vmatpush.msra.mxu3 %v61_v14 }
  0x2c   :  { %91 = vmatpush.msra.mxu0 %v60_v15  ;;  %311 = vmatpush.msra.mxu1 %v60_v15 }
  0x2d   :  { %92 = vmatmul.f32.vlgmr.msra.gmra.mxu0 %v52_v16  ;;  %98 = vmatmul.f32.vlgmr.msra.gmra.mxu1 %v54_v17 }
  0x2e   :  { %312 = vmatpush.msra.mxu2 %v60_v15  ;;  %313 = vmatpush.msra.mxu3 %v60_v15 }
  0x2f   :  { %104 = vmatmul.f32.vlgmr.msra.gmra.mxu2 %v56_v18  ;;  %110 = vmatmul.f32.vlgmr.msra.gmra.mxu3 %v58_v19 }
  0x35   :  { %95 = vmatmul.f32.gmra.mxu0 %v53_v20  ;;  %101 = vmatmul.f32.gmra.mxu1 %v55_v21 }
  0x37   :  { %107 = vmatmul.f32.gmra.mxu2 %v57_v22  ;;  %113 = vmatmul.f32.gmra.mxu3 %v59_v23 }
  0xaa   :  { %v93_v24 = vpop.f32.mrf.mxu0  ;;  %v99_v30 = vpop.f32.mrf.mxu1 }
  0xab   :  { %vm129_vm0 = vcmp.gt.f32.partialorder %v93_v24, 1.0  ;;  %133 = vst [vmem:[#allocation10] sm:$0xff] %v93_v24 }
  0xac   :  { %v258_v26 = vsel %vm129_vm0, 1.0, %v429_v25  ;;  %v134_v27 = vsel %vm129_vm0, 0.0, %v93_v24 }
  0xad   :  { %132 = vst [vmem:[#allocation9] sm:$0xff] %v258_v26  ;;  %v135_v28 = vmul.f32 0.95, %v134_v27 }
  0xb2   :  { %v96_v29 = vpop.f32.mrf.mxu0  ;;  %v102_v36 = vpop.f32.mrf.mxu1 }
  0xb3   :  { %v138_v31 = vadd.f32 %v135_v28, %v96_v29  ;;  %v105_v40 = vpop.f32.mrf.mxu2  ;;  %v111_v50 = vpop.f32.mrf.mxu3 }
  0xb5   :  { %145 = vst [vmem:[#allocation10 + $0x8] sm:$0xff] %v138_v31  ;;  %vm139_vm1 = vcmp.gt.f32.partialorder %v138_v31, 1.0 }
  0xb6   :  { %v259_v32 = vsel %vm139_vm1, 1.0, %v429_v25  ;;  %v146_v33 = vsel %vm139_vm1, 0.0, %v138_v31 }
  0xb7   :  { %143 = vst [vmem:[#allocation9 + $0x8] sm:$0xff] %v259_v32  ;;  %v147_v34 = vmul.f32 0.95, %v146_v33 }
  0xb9   :  { %v150_v35 = vadd.f32 %v147_v34, %v99_v30 }
  0xbb   :  { %157 = vst [vmem:[#allocation10 + $0x10] sm:$0xff] %v150_v35  ;;  %vm151_vm2 = vcmp.gt.f32.partialorder %v150_v35, 1.0  ;;  %v108_v46 = vpop.f32.mrf.mxu2  ;;  %v114_v56 = vpop.f32.mrf.mxu3 }
  0xbc   :  { %v260_v37 = vsel %vm151_vm2, 1.0, %v429_v25  ;;  %v158_v38 = vsel %vm151_vm2, 0.0, %v150_v35 }
  0xbd   :  { %155 = vst [vmem:[#allocation9 + $0x10] sm:$0xff] %v260_v37  ;;  %v159_v39 = vmul.f32 0.95, %v158_v38 }
  0xbf   :  { %v162_v41 = vadd.f32 %v159_v39, %v102_v36 }
  0xc1   :  { %169 = vst [vmem:[#allocation10 + $0x18] sm:$0xff] %v162_v41  ;;  %vm163_vm3 = vcmp.gt.f32.partialorder %v162_v41, 1.0 }
  0xc2   :  { %v261_v42 = vsel %vm163_vm3, 1.0, %v429_v25  ;;  %v170_v43 = vsel %vm163_vm3, 0.0, %v162_v41 }
  0xc3   :  { %167 = vst [vmem:[#allocation9 + $0x18] sm:$0xff] %v261_v42  ;;  %v171_v44 = vmul.f32 0.95, %v170_v43 }
  0xc5   :  { %v174_v45 = vadd.f32 %v171_v44, %v105_v40 }
  0xc7   :  { %181 = vst [vmem:[#allocation10 + $0x20] sm:$0xff] %v174_v45  ;;  %vm175_vm4 = vcmp.gt.f32.partialorder %v174_v45, 1.0 }
  0xc8   :  { %v262_v47 = vsel %vm175_vm4, 1.0, %v429_v25  ;;  %v182_v48 = vsel %vm175_vm4, 0.0, %v174_v45 }
  0xc9   :  { %179 = vst [vmem:[#allocation9 + $0x20] sm:$0xff] %v262_v47  ;;  %v183_v49 = vmul.f32 0.95, %v182_v48 }
  0xcb   :  { %v186_v51 = vadd.f32 %v183_v49, %v108_v46 }
  0xcd   :  { %193 = vst [vmem:[#allocation10 + $0x28] sm:$0xff] %v186_v51  ;;  %vm187_vm5 = vcmp.gt.f32.partialorder %v186_v51, 1.0 }
  0xce   :  { %v263_v52 = vsel %vm187_vm5, 1.0, %v429_v25  ;;  %v194_v53 = vsel %vm187_vm5, 0.0, %v186_v51 }
  0xcf   :  { %191 = vst [vmem:[#allocation9 + $0x28] sm:$0xff] %v263_v52  ;;  %v195_v54 = vmul.f32 0.95, %v194_v53 }
  0xd1   :  { %v198_v55 = vadd.f32 %v195_v54, %v111_v50 }
  0xd3   :  { %205 = vst [vmem:[#allocation10 + $0x30] sm:$0xff] %v198_v55  ;;  %vm199_vm6 = vcmp.gt.f32.partialorder %v198_v55, 1.0 }
  0xd4   :  { %v264_v57 = vsel %vm199_vm6, 1.0, %v429_v25  ;;  %v206_v58 = vsel %vm199_vm6, 0.0, %v198_v55 }
  0xd5   :  { %203 = vst [vmem:[#allocation9 + $0x30] sm:$0xff] %v264_v57  ;;  %v207_v59 = vmul.f32 0.95, %v206_v58 }
  0xd7   :  { %v210_v60 = vadd.f32 %v207_v59, %v114_v56 }
  0xd9   :  { %vm211_vm7 = vcmp.gt.f32.partialorder %v210_v60, 1.0  ;;  %217 = vst [vmem:[#allocation10 + $0x38] sm:$0xff] %v210_v60 }
  0xda   :  { %v265_v61 = vsel %vm211_vm7, 1.0, %v429_v25  ;;  %245 = dma.vmem_to_hbm [thread:$0]  %s238_s1, 1024, %s240_s26, [#allocation11], %s426_s20, %s426_s20, %s427_s21  }
  0xdb   :  { %215 = vst [vmem:[#allocation9 + $0x38] sm:$0xff] %v265_v61 }
  0xdc   :  { %232 = dma.vmem_to_hbm [thread:$0]  %s225_s28, 1024, %s227_s4, [#allocation6], %s426_s20, %s426_s20, %s427_s21  }
  0xdd   :  { %421 = dma.done.wait [#allocation6], 1024  }
  0xde   :  { %422 = vsyncadd [#allocation6], 4294966272 }
  0xdf   :  { %423 = dma.done.wait [#allocation11], 1024  }
  0xe0   :  { %424 = vsyncadd [#allocation11], 4294966272 }
  0xe1   :  { %254 = vsyncpa [#allocation5], 1 }
  0xe2   :  { %255 = vsyncpa [#allocation8], 1 }
  0xe3   :  { %256 = vsyncpa [#allocation6], 1 }
  0xe4   :  { %257 = vsyncpa [#allocation11], 1 }

</bundles_post_ra>
